<compile_context>
chip_gen: v5e
topology: v5e:2x2
jax: 0.10.0
libtpu: 0.0.40
codegen_flags: <defaults>
</compile_context>

<pallas_src>
import functools

import jax
import jax.numpy as jnp
import numpy as np
from jax import lax
from jax.experimental import pallas as pl
from jax.experimental.pallas import tpu as pltpu

RANK = 64
# sizes = (n_users, n_time, n_poi, n_acc, n_delta_time, n_inv, n_tran, n_sim)
SIZES = (128, 12, 256, 10, 14, 11, 9, 16)
INIT_SIZE = 1e-3

# contract the last dim of both operands (no transpose materialized)
_DN_LAST = (((1,), (1,)), ((), ()))


# ----------------------------- Pallas kernels ------------------------------

def _proj_score_kernel(q_ref, u_ref, p_ref, o_ref):
    # score[b, n] = sum_k q[b,k] * ( p[n,k] - (u[b]·p[n]) * u[b,k] )
    #             = (q·p)[b,n] - (u·p)[b,n] * (q·u)[b]
    q = q_ref[...]
    u = u_ref[...]
    p = p_ref[...]
    qp = lax.dot_general(q, p, _DN_LAST, preferred_element_type=jnp.float32)
    up = lax.dot_general(u, p, _DN_LAST, preferred_element_type=jnp.float32)
    qu = jnp.sum(q * u, axis=1, keepdims=True)
    o_ref[...] = qp - up * qu


def proj_score(q, u, pois, tn=None):
    """Fused user-projection of the candidate table + bilinear score.

    q, u: (B, 2R)   pois: (N, 2R)   ->   (B, N)
    """
    B, D = q.shape
    N, _ = pois.shape
    if tn is None:
        tn = N                       # whole table in one block (fits VMEM easily)
    assert N % tn == 0, "candidate table size must be a multiple of the tile"
    return pl.pallas_call(
        _proj_score_kernel,
        out_shape=jax.ShapeDtypeStruct((B, N), jnp.float32),
        grid=(N // tn,),
        in_specs=[
            pl.BlockSpec((B, D), lambda j: (0, 0)),
            pl.BlockSpec((B, D), lambda j: (0, 0)),
            pl.BlockSpec((tn, D), lambda j: (j, 0)),
        ],
        out_specs=pl.BlockSpec((B, tn), lambda j: (0, j)),
        compiler_params=pltpu.CompilerParams(
            dimension_semantics=("parallel",)),
    )(q, u, pois)


def _packed_score_kernel(q_ref, w_ref, o_ref):
    # q, w packed as [re | im]; re·re + im·im == single K=2R inner product.
    o_ref[...] = lax.dot_general(q_ref[...], w_ref[...], _DN_LAST,
                                 preferred_element_type=jnp.float32)


def packed_complex_score(q_packed, w_packed, tn=None):
    """q_packed: (S, 2R)   w_packed: (U, 2R)   ->   (S, U)."""
    S, D = q_packed.shape
    U, _ = w_packed.shape
    if tn is None:
        tn = U
    assert U % tn == 0, "candidate table size must be a multiple of the tile"
    return pl.pallas_call(
        _packed_score_kernel,
        out_shape=jax.ShapeDtypeStruct((S, U), jnp.float32),
        grid=(U // tn,),
        in_specs=[
            pl.BlockSpec((S, D), lambda j: (0, 0)),
            pl.BlockSpec((tn, D), lambda j: (j, 0)),
        ],
        out_specs=pl.BlockSpec((S, tn), lambda j: (0, j)),
        compiler_params=pltpu.CompilerParams(
            dimension_semantics=("parallel",)),
    )(q_packed, w_packed)


def _mlp_packed_kernel(x_ref, w1_ref, b1_ref, w2_ref, b2_ref, o_ref):
    # x rows = [re rows ; im rows] stacked -> single matmul per layer,
    # output packed [re | im] along lanes (lane-dense 2R = 128 store).
    x = x_ref[...]                                              # (2P, 3R)
    h = jnp.dot(x, w1_ref[...], preferred_element_type=jnp.float32) + b1_ref[...]
    h = jnp.maximum(h, 0.0)
    y = jnp.dot(h, w2_ref[...], preferred_element_type=jnp.float32) + b2_ref[...]
    half = y.shape[0] // 2
    o_ref[...] = jnp.concatenate([y[:half, :], y[half:, :]], axis=1)   # (P, 2R)


def mlp_hidden2_out_packed(x_both, w1, b1, w2, b2):
    """x_both: (2P, 3R) with rows [re ; im]  ->  (P, 2R) packed [out_re | out_im]."""
    twoP = x_both.shape[0]
    P = twoP // 2
    R = w2.shape[1]
    return pl.pallas_call(
        _mlp_packed_kernel,
        out_shape=jax.ShapeDtypeStruct((P, 2 * R), jnp.float32),
        grid=(1,),
        in_specs=[
            pl.BlockSpec(x_both.shape, lambda i: (0, 0)),
            pl.BlockSpec(w1.shape, lambda i: (0, 0)),
            pl.BlockSpec(b1.shape, lambda i: (0, 0)),
            pl.BlockSpec(w2.shape, lambda i: (0, 0)),
            pl.BlockSpec(b2.shape, lambda i: (0, 0)),
        ],
        out_specs=pl.BlockSpec((P, 2 * R), lambda i: (0, 0)),
    )(x_both, w1, b1, w2, b2)


# ------------------------------- parameters --------------------------------

def init_params(key, sizes=SIZES, rank=RANK):
    emb_rows = [sizes[2], sizes[6], sizes[2], sizes[5], sizes[3], sizes[4],
                sizes[4], sizes[4], sizes[1], sizes[1], sizes[0], sizes[7]]
    keys = jax.random.split(key, len(emb_rows) + 4)
    emb = [INIT_SIZE * jax.random.normal(keys[i], (n, 2 * rank), jnp.float32)
           for i, n in enumerate(emb_rows)]
    k1, k2, k3, k4 = keys[len(emb_rows):]
    # hidden2: Linear(rank*3, 200); out: Linear(200, rank)   (stored as (in, out))
    b_h = 1.0 / np.sqrt(rank * 3)
    b_o = 1.0 / np.sqrt(200)
    w1 = jax.random.uniform(k1, (rank * 3, 200), jnp.float32, -b_h, b_h)
    b1 = jax.random.uniform(k2, (1, 200), jnp.float32, -b_h, b_h)
    w2 = jax.random.uniform(k3, (200, rank), jnp.float32, -b_o, b_o)
    b2 = jax.random.uniform(k4, (1, rank), jnp.float32, -b_o, b_o)
    return {"emb": emb, "w1": w1, "b1": b1, "w2": w2, "b2": b2}


# -------------------------------- forward ----------------------------------

@functools.partial(jax.jit, static_argnames=())
def forward(params, x, path2_origin, path2_mid, path2_user, similar):
    emb = params["emb"]
    R = RANK

    def proj_user(ent, user):
        return ent - user * jnp.sum(user * ent, axis=1, keepdims=True)

    def split(e):
        return e[:, :R], e[:, R:]

    def diachronic(idx):
        a = emb[5][idx]
        freq = emb[6][idx]
        phi = emb[7][idx]
        t = idx.astype(jnp.float32).reshape(-1, 1)
        return a * jnp.sin(freq * t + phi)

    origin = emb[0][x[:, 6]]
    tran = emb[1][x[:, 8]]
    loc = emb[2][x[:, 3]]
    inv = emb[3][x[:, 5]]
    acc = emb[4][x[:, 2]]
    delta = diachronic(x[:, 7])
    tim1 = emb[8][x[:, 4]]
    tim = emb[9][x[:, 1]]
    user = emb[10][x[:, 0]]

    origin = proj_user(origin, user)
    tran = proj_user(tran, user)
    loc = proj_user(loc, user)
    inv = proj_user(inv, user)
    acc = proj_user(acc, user)
    delta = proj_user(delta, user)
    tim1 = proj_user(tim1, user)
    tim = proj_user(tim, user)

    o0, o1 = split(origin)
    t0, t1 = split(tran)

    pois = emb[2]  # (N_poi, 2R) candidate table

    # main query rows (test_transition=True branch)
    q_full = jnp.concatenate([o0 * t0 - o1 * t1, o0 * t1 + o1 * t0], axis=1)

    # path2 branch
    user2 = emb[10][path2_user]
    p2o = proj_user(emb[0][path2_origin], user2)
    p2m = proj_user(emb[0][path2_mid], user2)
    tran_idx = jnp.full((path2_origin.shape[0],), x[0, 8])
    p2t = proj_user(emb[1][tran_idx], user2)
    p2o0, p2o1 = split(p2o)
    p2m0, p2m1 = split(p2m)
    p2t0, p2t1 = split(p2t)

    # fused MLP: re/im stacked along rows -> single weight DMA, packed output
    path2_re = jnp.concatenate([p2t0, p2t0, p2m0], axis=1)     # (P, 3R)
    path2_im = jnp.concatenate([p2t1, p2t1, p2m1], axis=1)     # (P, 3R)
    rp_packed = mlp_hidden2_out_packed(
        jnp.concatenate([path2_re, path2_im], axis=0),
        params["w1"], params["b1"], params["w2"], params["b2"])   # (P, 2R)
    rp0, rp1 = rp_packed[:, :R], rp_packed[:, R:]
    eng2_0 = rp0 - p2t0
    eng2_1 = rp1 - p2t1
    q2_full = jnp.concatenate([p2o0 * rp0 - p2o1 * rp1,
                               p2o0 * rp1 + p2o1 * rp0], axis=1)

    # SINGLE fused proj+score call for both branches: POI table DMA'd once.
    q_all = jnp.concatenate([q_full, q2_full], axis=0)          # (B+P, 2R)
    u_all = jnp.concatenate([user, user2], axis=0)              # (B+P, 2R)
    score_all = proj_score(q_all, u_all, pois)                  # (B+P, N_poi)
    B = q_full.shape[0]
    score = score_all[:B]
    path2_score = score_all[B:]

    # similarity branch: one K=2R matmul against the unsplit user table
    user1 = emb[10][similar[:, 0]]
    user1 = user1 / jnp.maximum(
        jnp.linalg.norm(user1, axis=1, keepdims=True), 1e-12)
    sim = emb[11][similar[:, 1]]
    u0, u1 = split(user1)
    s0, s1 = split(sim)
    q_sim = jnp.concatenate([u0 * s0 - u1 * s1, u1 * s0 + u0 * s1], axis=1)
    sim_score = packed_complex_score(q_sim, emb[10])            # (S, n_users)

    # regularizers: sqrt(re^2 + im^2) for each projected query embedding
    reg = tuple(
        jnp.sqrt(a ** 2 + b ** 2)
        for a, b in (split(origin), split(tran), split(acc), split(inv),
                     split(loc), split(delta), split(tim1), split(tim))
    )
    # len(eng2) == 2 in the PyTorch code (tuple of two tensors)
    eng2_norm = jnp.sum(jnp.sqrt(eng2_0 ** 2 + eng2_1 ** 2)) / 2.0

    return score, sim_score, path2_score, reg, eng2_norm


# ------------------------------ reference check ----------------------------

def _ref_proj_score(q, u, pois):
    # literal proj_users + bmm semantics from the PyTorch module
    tmp = u @ pois.T                                            # (B, N)
    right = pois[None, :, :] - tmp[:, :, None] * u[:, None, :]  # (B, N, 2R)
    return jnp.einsum("bk,bnk->bn", q, right)


# ---------------------------------- main ------------------------------------

if __name__ == "__main__":
    key = jax.random.PRNGKey(0)
    k_par, k_x, k_p1, k_p2, k_p3, k_s1, k_s2 = jax.random.split(key, 7)

    params = init_params(k_par)

    B, P, S = 8, 8, 8
    # x columns: 0=user 1=tim 2=acc 3=loc 4=tim1 5=inv 6=origin 7=delta_t 8=tran
    col_max = [SIZES[0], SIZES[1], SIZES[3], SIZES[2], SIZES[1],
               SIZES[5], SIZES[2], SIZES[4], SIZES[6]]
    xcols = jax.random.split(k_x, 9)
    x = jnp.stack(
        [jax.random.randint(xcols[c], (B,), 0, col_max[c], dtype=jnp.int32)
         for c in range(9)], axis=1)

    path2_origin = jax.random.randint(k_p1, (P,), 0, SIZES[2], dtype=jnp.int32)
    path2_mid = jax.random.randint(k_p2, (P,), 0, SIZES[2], dtype=jnp.int32)
    path2_user = jax.random.randint(k_p3, (P,), 0, SIZES[0], dtype=jnp.int32)
    similar = jnp.stack(
        [jax.random.randint(k_s1, (S,), 0, SIZES[0], dtype=jnp.int32),
         jax.random.randint(k_s2, (S,), 0, SIZES[7], dtype=jnp.int32)], axis=1)

    outs = forward(params, x, path2_origin, path2_mid, path2_user, similar)
    outs = jax.block_until_ready(outs)
    score, sim_score, path2_score, reg, eng2_norm = outs

    # numerical sanity check: fused proj+score kernel vs literal torch math
    emb = params["emb"]
    user = emb[10][x[:, 0]]
    origin = emb[0][x[:, 6]]
    tran = emb[1][x[:, 8]]
    origin = origin - user * jnp.sum(user * origin, axis=1, keepdims=True)
    tran = tran - user * jnp.sum(user * tran, axis=1, keepdims=True)
    o0, o1 = origin[:, :RANK], origin[:, RANK:]
    t0, t1 = tran[:, :RANK], tran[:, RANK:]
    q_full = jnp.concatenate([o0 * t0 - o1 * t1, o0 * t1 + o1 * t0], axis=1)
    ref = _ref_proj_score(q_full, user, emb[2])
    np.testing.assert_allclose(np.asarray(score), np.asarray(ref),
                               rtol=1e-4, atol=1e-8)

    # sanity check: packed single-matmul complex score vs split re/im math
    user1 = emb[10][similar[:, 0]]
    user1 = user1 / jnp.maximum(jnp.linalg.norm(user1, axis=1, keepdims=True), 1e-12)
    sim = emb[11][similar[:, 1]]
    u0, u1 = user1[:, :RANK], user1[:, RANK:]
    s0, s1 = sim[:, :RANK], sim[:, RANK:]
    w_re, w_im = emb[10][:, :RANK], emb[10][:, RANK:]
    ref_sim = (u0 * s0 - u1 * s1) @ w_re.T + (u1 * s0 + u0 * s1) @ w_im.T
    np.testing.assert_allclose(np.asarray(sim_score), np.asarray(ref_sim),
                               rtol=1e-4, atol=1e-8)

    assert score.shape == (B, SIZES[2])
    assert sim_score.shape == (S, SIZES[0])
    assert path2_score.shape == (P, SIZES[2])
    assert all(r.shape == (B, RANK) for r in reg)
    assert eng2_norm.shape == ()

    print("KERNEL_OK")
</pallas_src>

<mosaic_0001>
module attributes {stable_mosaic.version = 11 : i64} {
  func.func @_mlp_packed_kernel(%arg0: i32, %arg1: memref<16x192xf32, #tpu.memory_space<vmem>>, %arg2: memref<192x200xf32, #tpu.memory_space<vmem>>, %arg3: memref<1x200xf32, #tpu.memory_space<vmem>>, %arg4: memref<200x64xf32, #tpu.memory_space<vmem>>, %arg5: memref<1x64xf32, #tpu.memory_space<vmem>>, %arg6: memref<8x128xf32, #tpu.memory_space<vmem>>) attributes {dimension_semantics = [#tpu.dimension_semantics<arbitrary>], iteration_bounds = array<i64: 1>, scalar_prefetch = 0 : i64, scratch_operands = 0 : i64, tpu.core_type = #tpu.core_type<tc>, window_params = [{pipeline_mode = #tpu.pipeline_mode<synchronous>, transform_indices = @transform_0, window_bounds = array<i64: 16, 192>}, {pipeline_mode = #tpu.pipeline_mode<synchronous>, transform_indices = @transform_1, window_bounds = array<i64: 192, 200>}, {pipeline_mode = #tpu.pipeline_mode<synchronous>, transform_indices = @transform_2, window_bounds = array<i64: 1, 200>}, {pipeline_mode = #tpu.pipeline_mode<synchronous>, transform_indices = @transform_3, window_bounds = array<i64: 200, 64>}, {pipeline_mode = #tpu.pipeline_mode<synchronous>, transform_indices = @transform_4, window_bounds = array<i64: 1, 64>}, {pipeline_mode = #tpu.pipeline_mode<synchronous>, transform_indices = @transform_5, window_bounds = array<i64: 8, 128>}]} {
    %c0 = arith.constant 0 : index
    %c0_0 = arith.constant 0 : index
    %0 = vector.load %arg1[%c0, %c0_0] : memref<16x192xf32, #tpu.memory_space<vmem>>, vector<16x192xf32>
    %c0_1 = arith.constant 0 : index
    %c0_2 = arith.constant 0 : index
    %1 = vector.load %arg2[%c0_1, %c0_2] : memref<192x200xf32, #tpu.memory_space<vmem>>, vector<192x200xf32>
    %cst = arith.constant dense<0.000000e+00> : vector<16x200xf32>
    %2 = tpu.matmul %0, %1, %cst {dimension_numbers = #tpu.dot_dimension_numbers<[1], [0], [0], [1], [0, 0, 1, 1], [], []>} : vector<16x192xf32>, vector<192x200xf32>, vector<16x200xf32> -> vector<16x200xf32>
    %c0_3 = arith.constant 0 : index
    %c0_4 = arith.constant 0 : index
    %3 = vector.load %arg3[%c0_3, %c0_4] : memref<1x200xf32, #tpu.memory_space<vmem>>, vector<1x200xf32>
    %4 = vector.broadcast %3 : vector<1x200xf32> to vector<16x200xf32>
    %5 = arith.addf %2, %4 : vector<16x200xf32>
    %cst_5 = arith.constant 0.000000e+00 : f32
    %6 = vector.broadcast %cst_5 : f32 to vector<16x200xf32>
    %7 = arith.maximumf %5, %6 : vector<16x200xf32>
    %c0_6 = arith.constant 0 : index
    %c0_7 = arith.constant 0 : index
    %8 = vector.load %arg4[%c0_6, %c0_7] : memref<200x64xf32, #tpu.memory_space<vmem>>, vector<200x64xf32>
    %cst_8 = arith.constant dense<0.000000e+00> : vector<16x64xf32>
    %9 = tpu.matmul %7, %8, %cst_8 {dimension_numbers = #tpu.dot_dimension_numbers<[1], [0], [0], [1], [0, 0, 1, 1], [], []>} : vector<16x200xf32>, vector<200x64xf32>, vector<16x64xf32> -> vector<16x64xf32>
    %c0_9 = arith.constant 0 : index
    %c0_10 = arith.constant 0 : index
    %10 = vector.load %arg5[%c0_9, %c0_10] : memref<1x64xf32, #tpu.memory_space<vmem>>, vector<1x64xf32>
    %11 = vector.broadcast %10 : vector<1x64xf32> to vector<16x64xf32>
    %12 = arith.addf %9, %11 : vector<16x64xf32>
    %13 = vector.extract_strided_slice %12 {offsets = [0, 0], sizes = [8, 64], strides = [1, 1]} : vector<16x64xf32> to vector<8x64xf32>
    %14 = vector.extract_strided_slice %12 {offsets = [8, 0], sizes = [8, 64], strides = [1, 1]} : vector<16x64xf32> to vector<8x64xf32>
    %15 = tpu.concatenate %13, %14 in 1 : vector<8x64xf32>, vector<8x64xf32> -> vector<8x128xf32>
    %c0_11 = arith.constant 0 : index
    %c0_12 = arith.constant 0 : index
    %16 = vector.load %arg6[%c0_11, %c0_12] : memref<8x128xf32, #tpu.memory_space<vmem>>, vector<8x128xf32>
    tpu.vector_store %arg6[%c0_11, %c0_12], %15 {strides = array<i32>} : memref<8x128xf32, #tpu.memory_space<vmem>>, vector<8x128xf32>,
    return
  }
  func.func @transform_0(%arg0: i32) -> (i32, i32) {
    %c0_i32 = arith.constant 0 : i32
    %c0_i32_0 = arith.constant 0 : i32
    %c0_i32_1 = arith.constant 0 : i32
    return %c0_i32, %c0_i32_0 : i32, i32
  }
  func.func @transform_1(%arg0: i32) -> (i32, i32) {
    %c0_i32 = arith.constant 0 : i32
    %c0_i32_0 = arith.constant 0 : i32
    %c0_i32_1 = arith.constant 0 : i32
    return %c0_i32, %c0_i32_0 : i32, i32
  }
  func.func @transform_2(%arg0: i32) -> (i32, i32) {
    %c0_i32 = arith.constant 0 : i32
    %c0_i32_0 = arith.constant 0 : i32
    %c0_i32_1 = arith.constant 0 : i32
    return %c0_i32, %c0_i32_0 : i32, i32
  }
  func.func @transform_3(%arg0: i32) -> (i32, i32) {
    %c0_i32 = arith.constant 0 : i32
    %c0_i32_0 = arith.constant 0 : i32
    %c0_i32_1 = arith.constant 0 : i32
    return %c0_i32, %c0_i32_0 : i32, i32
  }
  func.func @transform_4(%arg0: i32) -> (i32, i32) {
    %c0_i32 = arith.constant 0 : i32
    %c0_i32_0 = arith.constant 0 : i32
    %c0_i32_1 = arith.constant 0 : i32
    return %c0_i32, %c0_i32_0 : i32, i32
  }
  func.func @transform_5(%arg0: i32) -> (i32, i32) {
    %c0_i32 = arith.constant 0 : i32
    %c0_i32_0 = arith.constant 0 : i32
    %c0_i32_1 = arith.constant 0 : i32
    return %c0_i32, %c0_i32_0 : i32, i32
  }
}

module attributes {stable_mosaic.version = 11 : i64} {
  func.func @_proj_score_kernel(%arg0: i32, %arg1: memref<16x128xf32, #tpu.memory_space<vmem>>, %arg2: memref<16x128xf32, #tpu.memory_space<vmem>>, %arg3: memref<256x128xf32, #tpu.memory_space<vmem>>, %arg4: memref<16x256xf32, #tpu.memory_space<vmem>>) attributes {dimension_semantics = [#tpu.dimension_semantics<parallel>], iteration_bounds = array<i64: 1>, scalar_prefetch = 0 : i64, scratch_operands = 0 : i64, tpu.core_type = #tpu.core_type<tc>, window_params = [{pipeline_mode = #tpu.pipeline_mode<synchronous>, transform_indices = @transform_0, window_bounds = array<i64: 16, 128>}, {pipeline_mode = #tpu.pipeline_mode<synchronous>, transform_indices = @transform_1, window_bounds = array<i64: 16, 128>}, {transform_indices = @transform_2, window_bounds = array<i64: 256, 128>}, {transform_indices = @transform_3, window_bounds = array<i64: 16, 256>}]} {
    %c0 = arith.constant 0 : index
    %c0_0 = arith.constant 0 : index
    %0 = vector.load %arg1[%c0, %c0_0] : memref<16x128xf32, #tpu.memory_space<vmem>>, vector<16x128xf32>
    %c0_1 = arith.constant 0 : index
    %c0_2 = arith.constant 0 : index
    %1 = vector.load %arg2[%c0_1, %c0_2] : memref<16x128xf32, #tpu.memory_space<vmem>>, vector<16x128xf32>
    %c0_3 = arith.constant 0 : index
    %c0_4 = arith.constant 0 : index
    %2 = vector.load %arg3[%c0_3, %c0_4] : memref<256x128xf32, #tpu.memory_space<vmem>>, vector<256x128xf32>
    %cst = arith.constant dense<0.000000e+00> : vector<16x256xf32>
    %3 = tpu.matmul %0, %2, %cst {dimension_numbers = #tpu.dot_dimension_numbers<[1], [1], [0], [0], [0, 0, 1, 0], [], []>} : vector<16x128xf32>, vector<256x128xf32>, vector<16x256xf32> -> vector<16x256xf32>
    %cst_5 = arith.constant dense<0.000000e+00> : vector<16x256xf32>
    %4 = tpu.matmul %1, %2, %cst_5 {dimension_numbers = #tpu.dot_dimension_numbers<[1], [1], [0], [0], [0, 0, 1, 0], [], []>} : vector<16x128xf32>, vector<256x128xf32>, vector<16x256xf32> -> vector<16x256xf32>
    %5 = arith.mulf %0, %1 : vector<16x128xf32>
    %cst_6 = arith.constant dense<0.000000e+00> : vector<16xf32>
    %6 = vector.multi_reduction <add>, %5, %cst_6 [1] : vector<16x128xf32> to vector<16xf32>
    %7 = vector.shape_cast %6 : vector<16xf32> to vector<16x1xf32>
    %8 = vector.broadcast %7 : vector<16x1xf32> to vector<16x256xf32>
    %9 = arith.mulf %4, %8 : vector<16x256xf32>
    %10 = arith.subf %3, %9 : vector<16x256xf32>
    %c0_7 = arith.constant 0 : index
    %c0_8 = arith.constant 0 : index
    %11 = vector.load %arg4[%c0_7, %c0_8] : memref<16x256xf32, #tpu.memory_space<vmem>>, vector<16x256xf32>
    tpu.vector_store %arg4[%c0_7, %c0_8], %10 {strides = array<i32>} : memref<16x256xf32, #tpu.memory_space<vmem>>, vector<16x256xf32>,
    return
  }
  func.func @transform_0(%arg0: i32) -> (i32, i32) {
    %c0_i32 = arith.constant 0 : i32
    %c0_i32_0 = arith.constant 0 : i32
    %c0_i32_1 = arith.constant 0 : i32
    return %c0_i32, %c0_i32_0 : i32, i32
  }
  func.func @transform_1(%arg0: i32) -> (i32, i32) {
    %c0_i32 = arith.constant 0 : i32
    %c0_i32_0 = arith.constant 0 : i32
    %c0_i32_1 = arith.constant 0 : i32
    return %c0_i32, %c0_i32_0 : i32, i32
  }
  func.func @transform_2(%arg0: i32) -> (i32, i32) {
    %c0_i32 = arith.constant 0 : i32
    %c0_i32_0 = arith.constant 0 : i32
    return %arg0, %c0_i32 : i32, i32
  }
  func.func @transform_3(%arg0: i32) -> (i32, i32) {
    %c0_i32 = arith.constant 0 : i32
    %c0_i32_0 = arith.constant 0 : i32
    return %c0_i32, %arg0 : i32, i32
  }
}

module attributes {stable_mosaic.version = 11 : i64} {
  func.func @_packed_score_kernel(%arg0: i32, %arg1: memref<8x128xf32, #tpu.memory_space<vmem>>, %arg2: memref<128x128xf32, #tpu.memory_space<vmem>>, %arg3: memref<8x128xf32, #tpu.memory_space<vmem>>) attributes {dimension_semantics = [#tpu.dimension_semantics<parallel>], iteration_bounds = array<i64: 1>, scalar_prefetch = 0 : i64, scratch_operands = 0 : i64, tpu.core_type = #tpu.core_type<tc>, window_params = [{pipeline_mode = #tpu.pipeline_mode<synchronous>, transform_indices = @transform_0, window_bounds = array<i64: 8, 128>}, {transform_indices = @transform_1, window_bounds = array<i64: 128, 128>}, {transform_indices = @transform_2, window_bounds = array<i64: 8, 128>}]} {
    %c0 = arith.constant 0 : index
    %c0_0 = arith.constant 0 : index
    %0 = vector.load %arg1[%c0, %c0_0] : memref<8x128xf32, #tpu.memory_space<vmem>>, vector<8x128xf32>
    %c0_1 = arith.constant 0 : index
    %c0_2 = arith.constant 0 : index
    %1 = vector.load %arg2[%c0_1, %c0_2] : memref<128x128xf32, #tpu.memory_space<vmem>>, vector<128x128xf32>
    %cst = arith.constant dense<0.000000e+00> : vector<8x128xf32>
    %2 = tpu.matmul %0, %1, %cst {dimension_numbers = #tpu.dot_dimension_numbers<[1], [1], [0], [0], [0, 0, 1, 0], [], []>} : vector<8x128xf32>, vector<128x128xf32>, vector<8x128xf32> -> vector<8x128xf32>
    %c0_3 = arith.constant 0 : index
    %c0_4 = arith.constant 0 : index
    %3 = vector.load %arg3[%c0_3, %c0_4] : memref<8x128xf32, #tpu.memory_space<vmem>>, vector<8x128xf32>
    tpu.vector_store %arg3[%c0_3, %c0_4], %2 {strides = array<i32>} : memref<8x128xf32, #tpu.memory_space<vmem>>, vector<8x128xf32>,
    return
  }
  func.func @transform_0(%arg0: i32) -> (i32, i32) {
    %c0_i32 = arith.constant 0 : i32
    %c0_i32_0 = arith.constant 0 : i32
    %c0_i32_1 = arith.constant 0 : i32
    return %c0_i32, %c0_i32_0 : i32, i32
  }
  func.func @transform_1(%arg0: i32) -> (i32, i32) {
    %c0_i32 = arith.constant 0 : i32
    %c0_i32_0 = arith.constant 0 : i32
    return %arg0, %c0_i32 : i32, i32
  }
  func.func @transform_2(%arg0: i32) -> (i32, i32) {
    %c0_i32 = arith.constant 0 : i32
    %c0_i32_0 = arith.constant 0 : i32
    return %c0_i32, %arg0 : i32, i32
  }
}

</mosaic_0001>

<bundles_post_ra>
// kernel: forward.3
= control target key start
LH: loop header
LB: loop body
LE: loop exit
PB: predicated region body
PF: predicated region fallthrough
CT: control target
= control target key end

     0   :  { %10 = vsyncpa [#allocation3], 0  ;;  %s327_s21 = smov [#allocation2]   ;;  %s328_s23 = smov 256   ;;  %s465_s0 = inlined_call_operand.vmem [shape: f32[16,192], index: 0, kind: input, shape index: {}]   ;;  %s466_s1 = inlined_call_operand.hbm [shape: f32[192,200], index: 1, kind: input, shape index: {}]   ;;  %s467_s2 = inlined_call_operand.vmem [shape: f32[1,200], index: 2, kind: input, shape index: {}]   ;;  %s468_s3 = inlined_call_operand.vmem [shape: f32[200,64], index: 3, kind: input, shape index: {}]   ;;  %s469_s4 = inlined_call_operand.vmem [shape: f32[1,64], index: 4, kind: input, shape index: {}]   ;;  %s470_s5 = inlined_call_operand.vmem [shape: f32[8,128], index: 5, kind: output, shape index: {}]  }
   0x1   :  { %s17_s20 = sshll.u32 %s466_s1, 4  ;;  %s19_s22 = sshll.u32 %s327_s21, 4  ;;  %s18_s20 = int_to_ptr.hbm [resolvable:$true] %s17_s20  ;;  %s20_s22 = int_to_ptr.vmem [resolvable:$true] %s19_s22 }
   0x2   :  { %s329_s24 = smov 16  }
   0x3   :  { %25 = dma.hbm_to_vmem [thread:$0]  %s18_s20, 6144, %s20_s22, [#allocation3], %s328_s23, %s328_s23, %s329_s24  }
   0x4   :  { %325 = dma.done.wait [#allocation3], 6144  }
   0x5   :  { %326 = vsyncadd [#allocation3], 4294961152  ;;  %v71_v0 = vld [vmem:[#allocation2 + $0xf8] sm:$0xff]  ;;  %v69_v1 = vld [vmem:[#allocation2 + $0xe8] sm:$0xff]  ;;  %vm94_vm0 = vcmask 523264   ;;  %vm226_vm1 = vcmask 588800  }
   0x6   :  { %147 = vmatpush.msra.mxu2 %v71_v0  ;;  %v70_v2 = vld [vmem:[#allocation2 + $0xf0] sm:$0xff]  ;;  %v67_v3 = vld [vmem:[#allocation2 + $0xd8] sm:$0xff]  ;;  %v68_v4 = vld [vmem:[#allocation2 + $0xe0] sm:$0xff]  ;;  %s330_s6 = smov 64  }
   0x7   :  { %101 = vmatpush.msra.mxu0 %v70_v2  ;;  %v66_v5 = vld [vmem:[#allocation2 + $0xd0] sm:$0xff]  ;;  %v65_v6 = vld [vmem:[#allocation2 + $0xc8] sm:$0xff]  ;;  %v64_v7 = vld [vmem:[#allocation2 + $0xc0] sm:$0xff] }
   0x8   :  { %148 = vmatpush.msra.mxu2 %v69_v1  ;;  %v87_v8 = vld [vmem:[#allocation2 + $0x178] sm:$0xff]  ;;  %v85_v10 = vld [vmem:[#allocation2 + $0x168] sm:$0xff]  ;;  %v62_v11 = vld [vmem:[#allocation2 + $0xb0] sm:$0xff] }
   0x9   :  { %102 = vmatpush.msra.mxu0 %v68_v4  ;;  %v63_v9 = vld [vmem:[#allocation2 + $0xb8] sm:$0xff]  ;;  %178 = vmatpush.msra.mxu3 %v87_v8  ;;  %v61_v13 = vld [vmem:[#allocation2 + $0xa8] sm:$0xff]  ;;  %v60_v14 = vld [vmem:[#allocation2 + $0xa0] sm:$0xff] }
   0xa   :  { %149 = vmatpush.msra.mxu2 %v67_v3  ;;  %v83_v12 = vld [vmem:[#allocation2 + $0x158] sm:$0xff]  ;;  %v81_v15 = vld [vmem:[#allocation2 + $0x148] sm:$0xff]  ;;  %v86_v16 = vld [vmem:[#allocation2 + $0x170] sm:$0xff] }
   0xb   :  { %103 = vmatpush.msra.mxu0 %v66_v5  ;;  %179 = vmatpush.msra.mxu3 %v85_v10  ;;  %v59_v17 = vld [vmem:[#allocation2 + $0x98] sm:$0xff]  ;;  %v58_v18 = vld [vmem:[#allocation2 + $0x90] sm:$0xff]  ;;  %v84_v20 = vld [vmem:[#allocation2 + $0x160] sm:$0xff] }
   0xc   :  { %150 = vmatpush.msra.mxu2 %v65_v6  ;;  %v79_v19 = vld [vmem:[#allocation2 + $0x138] sm:$0xff]  ;;  %132 = vmatpush.msra.mxu1 %v86_v16  ;;  %v57_v21 = vld [vmem:[#allocation2 + $0x88] sm:$0xff]  ;;  %v82_v22 = vld [vmem:[#allocation2 + $0x150] sm:$0xff] }
   0xd   :  { %104 = vmatpush.msra.mxu0 %v64_v7  ;;  %180 = vmatpush.msra.mxu3 %v83_v12  ;;  %v56_v23 = vld [vmem:[#allocation2 + $0x80] sm:$0xff]  ;;  %v77_v24 = vld [vmem:[#allocation2 + $0x128] sm:$0xff]  ;;  %v55_v25 = vld [vmem:[#allocation2 + $0x78] sm:$0xff] }
   0xe   :  { %151 = vmatpush.msra.mxu2 %v63_v9  ;;  %133 = vmatpush.msra.mxu1 %v84_v20  ;;  %v80_v26 = vld [vmem:[#allocation2 + $0x140] sm:$0xff]  ;;  %v54_v27 = vld [vmem:[#allocation2 + $0x70] sm:$0xff]  ;;  %v75_v28 = vld [vmem:[#allocation2 + $0x118] sm:$0xff] }
   0xf   :  { %105 = vmatpush.msra.mxu0 %v62_v11  ;;  %181 = vmatpush.msra.mxu3 %v81_v15  ;;  %v53_v29 = vld [vmem:[#allocation2 + $0x68] sm:$0xff]  ;;  %v78_v30 = vld [vmem:[#allocation2 + $0x130] sm:$0xff]  ;;  %v52_v31 = vld [vmem:[#allocation2 + $0x60] sm:$0xff] }
  0x10   :  { %152 = vmatpush.msra.mxu2 %v61_v13  ;;  %134 = vmatpush.msra.mxu1 %v82_v22  ;;  %v73_v32 = vld [vmem:[#allocation2 + $0x108] sm:$0xff]  ;;  %v51_v33 = vld [vmem:[#allocation2 + $0x58] sm:$0xff]  ;;  %v50_v35 = vld [vmem:[#allocation2 + $0x50] sm:$0xff] }
  0x11   :  { %106 = vmatpush.msra.mxu0 %v60_v14  ;;  %182 = vmatpush.msra.mxu3 %v79_v19  ;;  %v37_v34 = vld [vmem:[%s465_s0 + $0x8] sm:$0xff]  ;;  %v76_v36 = vld [vmem:[#allocation2 + $0x120] sm:$0xff]  ;;  %v74_v40 = vld [vmem:[#allocation2 + $0x110] sm:$0xff] }
  0x12   :  { %153 = vmatpush.msra.mxu2 %v59_v17  ;;  %135 = vmatpush.msra.mxu1 %v80_v26  ;;  %v49_v37 = vld [vmem:[#allocation2 + $0x48] sm:$0xff]  ;;  %v221_v38 = vld [vmem:[%s468_s3 + $0xc0] sm:$0xff]  ;;  %v47_v41 = vld [vmem:[#allocation2 + $0x38] sm:$0xff] }
  0x13   :  { %107 = vmatpush.msra.mxu0 %v58_v18  ;;  %183 = vmatpush.msra.mxu3 %v77_v24  ;;  %v48_v39 = vld [vmem:[#allocation2 + $0x40] sm:$0xff]  ;;  %v220_v42 = vld [vmem:[%s468_s3 + $0xb8] sm:$0xff]  ;;  %v46_v43 = vld [vmem:[#allocation2 + $0x30] sm:$0xff] }
  0x14   :  { %154 = vmatpush.msra.mxu2 %v57_v21  ;;  %136 = vmatpush.msra.mxu1 %v78_v30  ;;  %v72_v44 = vld [vmem:[#allocation2 + $0x100] sm:$0xff]  ;;  %v45_v45 = vld [vmem:[#allocation2 + $0x28] sm:$0xff]  ;;  %v212_v47 = vld [vmem:[%s468_s3 + $0x78] sm:$0xff] }
  0x15   :  { %108 = vmatpush.msra.mxu0 %v56_v23  ;;  %184 = vmatpush.msra.mxu3 %v75_v28  ;;  %v44_v46 = vld [vmem:[#allocation2 + $0x20] sm:$0xff]  ;;  %v43_v48 = vld [vmem:[#allocation2 + $0x18] sm:$0xff]  ;;  %v42_v50 = vld [vmem:[#allocation2 + $0x10] sm:$0xff] }
  0x16   :  { %155 = vmatpush.msra.mxu2 %v55_v25  ;;  %137 = vmatpush.msra.mxu1 %v76_v36  ;;  %v39_v49 = vld [vmem:[%s465_s0 + $0x18] sm:$0xff]  ;;  %v211_v51 = vld [vmem:[%s468_s3 + $0x70] sm:$0xff]  ;;  %v41_v52 = vld [vmem:[#allocation2 + $0x8] sm:$0xff] }
  0x17   :  { %109 = vmatpush.msra.mxu0 %v54_v27  ;;  %185 = vmatpush.msra.mxu3 %v73_v32  ;;  %v219_v53 = vld [vmem:[%s468_s3 + $0xb0] sm:$0xff]  ;;  %v36_v54 = vld [vmem:[%s465_s0] sm:$0xff]  ;;  %v210_v56 = vld [vmem:[%s468_s3 + $0x68] sm:$0xff] }
  0x18   :  { %156 = vmatpush.msra.mxu2 %v53_v29  ;;  %292 = vmatmul.msk.f32.vlgmr.msra.gmra.mxu3 %vm94_vm0, %v37_v34  ;;  %v40_v55 = vld [vmem:[#allocation2] sm:$0xff]  ;;  %v218_v57 = vld [vmem:[%s468_s3 + $0xa8] sm:$0xff]  ;;  %v208_v60 = vld [vmem:[%s468_s3 + $0x58] sm:$0xff] }
  0x19   :  { %110 = vmatpush.msra.mxu0 %v52_v31  ;;  %263 = vmatpush.msrb.mxu3 %v221_v38  ;;  %v209_v58 = vld [vmem:[%s468_s3 + $0x60] sm:$0xff]  ;;  %v38_v61 = vld [vmem:[%s465_s0 + $0x10] sm:$0xff]  ;;  %v206_v63 = vld [vmem:[%s468_s3 + $0x48] sm:$0xff] }
  0x1a   :  { %157 = vmatpush.msra.mxu2 %v51_v33  ;;  %138 = vmatpush.msra.mxu1 %v74_v40  ;;  %v217_v59 = vld [vmem:[%s468_s3 + $0xa0] sm:$0xff]  ;;  %v207_v62 = vld [vmem:[%s468_s3 + $0x50] sm:$0xff]  ;;  %v204_v1 = vld [vmem:[%s468_s3 + $0x38] sm:$0xff] }
  0x1b   :  { %111 = vmatpush.msra.mxu0 %v50_v35  ;;  %264 = vmatpush.msrb.mxu3 %v220_v42  ;;  %v205_v0 = vld [vmem:[%s468_s3 + $0x40] sm:$0xff]  ;;  %v203_v2 = vld [vmem:[%s468_s3 + $0x30] sm:$0xff]  ;;  %v202_v3 = vld [vmem:[%s468_s3 + $0x28] sm:$0xff] }
  0x1c   :  { %158 = vmatpush.msra.mxu2 %v49_v37  ;;  %139 = vmatpush.msra.mxu1 %v72_v44  ;;  %v216_v4 = vld [vmem:[%s468_s3 + $0x98] sm:$0xff]  ;;  %v201_v5 = vld [vmem:[%s468_s3 + $0x20] sm:$0xff]  ;;  %v215_v6 = vld [vmem:[%s468_s3 + $0x90] sm:$0xff] }
  0x1d   :  { %112 = vmatpush.msra.mxu0 %v48_v39  ;;  %290 = vmatmul.msk.f32.vlgmr.msra.gmra.mxu1 %vm94_vm0, %v37_v34  ;;  %v200_v7 = vld [vmem:[%s468_s3 + $0x18] sm:$0xff]  ;;  %v214_v8 = vld [vmem:[%s468_s3 + $0x88] sm:$0xff]  ;;  %v199_v9 = vld [vmem:[%s468_s3 + $0x10] sm:$0xff] }
  0x1e   :  { %159 = vmatpush.msra.mxu2 %v47_v41  ;;  %233 = vmatpush.msrb.mxu1 %v212_v47  ;;  %v213_v10 = vld [vmem:[%s468_s3 + $0x80] sm:$0xff]  ;;  %v198_v11 = vld [vmem:[%s468_s3 + $0x8] sm:$0xff] }
  0x1f   :  { %113 = vmatpush.msra.mxu0 %v46_v43  ;;  %265 = vmatpush.msrb.mxu3 %v219_v53  ;;  %v197_v12 = vld [vmem:[%s468_s3] sm:$0xff] }
  0x20   :  { %160 = vmatpush.msra.mxu2 %v45_v45  ;;  %293 = vmatmul.msk.f32.gmra.mxu3 %vm94_vm0, %v39_v49  ;;  %v88_v13 = vld [vmem:[%s467_s2] sm:$0x3] }
  0x21   :  { %114 = vmatpush.msra.mxu0 %v44_v46  ;;  %234 = vmatpush.msrb.mxu1 %v211_v51  ;;  %v90_v14 = vperm.slane %v88_v13, 0  ;;  %v91_v18 = vperm.slane %v88_v13, 1  ;;  %v300_v36 = vld [vmem:[%s469_s4] ss:$0 sm:$0xff] }
  0x22   :  { %161 = vmatpush.msra.mxu2 %v43_v48  ;;  %266 = vmatpush.msrb.mxu3 %v218_v57 }
  0x23   :  { %115 = vmatpush.msra.mxu0 %v42_v50  ;;  %235 = vmatpush.msrb.mxu1 %v210_v56 }
  0x24   :  { %162 = vmatpush.msra.mxu2 %v41_v52  ;;  %267 = vmatpush.msrb.mxu3 %v217_v59 }
  0x25   :  { %163 = vmatmul.f32.vlgmr.msra.gmra.mxu2 %v36_v54  ;;  %116 = vmatpush.msra.mxu0 %v40_v55 }
  0x26   :  { %117 = vmatmul.f32.vlgmr.msra.gmra.mxu0 %v36_v54  ;;  %291 = vmatmul.msk.f32.gmra.mxu1 %vm94_vm0, %v39_v49 }
  0x27   :  { %236 = vmatpush.msrb.mxu1 %v209_v58  ;;  %268 = vmatpush.msrb.mxu3 %v216_v4 }
  0x29   :  { %237 = vmatpush.msrb.mxu1 %v208_v60  ;;  %269 = vmatpush.msrb.mxu3 %v215_v6 }
  0x2b   :  { %238 = vmatpush.msrb.mxu1 %v207_v62  ;;  %270 = vmatpush.msrb.mxu3 %v214_v8 }
  0x2d   :  { %166 = vmatmul.f32.gmra.mxu2 %v38_v61  ;;  %239 = vmatpush.msrb.mxu1 %v206_v63 }
  0x2e   :  { %120 = vmatmul.f32.gmra.mxu0 %v38_v61  ;;  %271 = vmatpush.msrb.mxu3 %v213_v10 }
  0x2f   :  { %240 = vmatpush.msrb.mxu1 %v205_v0 }
  0x31   :  { %241 = vmatpush.msrb.mxu1 %v204_v1 }
  0x33   :  { %242 = vmatpush.msrb.mxu1 %v203_v2 }
  0x35   :  { %243 = vmatpush.msrb.mxu1 %v202_v3 }
  0x37   :  { %244 = vmatpush.msrb.mxu1 %v201_v5 }
  0x39   :  { %245 = vmatpush.msrb.mxu1 %v200_v7 }
  0x3b   :  { %246 = vmatpush.msrb.mxu1 %v199_v9 }
  0x3d   :  { %247 = vmatpush.msrb.mxu1 %v198_v11 }
  0x3f   :  { %248 = vmatpush.msrb.mxu1 %v197_v12 }
  0x9a   :  { %v141_v15 = vpop.f32.mrf.mxu1 }
  0x9b   :  { %v187_v19 = vpop.f32.mrf.mxu3 }
  0xa3   :  { %v118_v16 = vpop.f32.mrf.mxu0  ;;  %v144_v26 = vpop.f32.mrf.mxu1 }
  0xa4   :  { %v119_v17 = vadd.f32 %v118_v16, %v90_v14  ;;  %v190_v31 = vpop.f32.mrf.mxu3 }
  0xa6   :  { %v142_v20 = vadd.f32 %v141_v15, %v119_v17 }
  0xa8   :  { %v164_v21 = vpop.f32.mrf.mxu2  ;;  %v193_v22 = vmax.f32 %v142_v20, 0.0 }
  0xa9   :  { %v165_v23 = vadd.f32 %v164_v21, %v91_v18 }
  0xaa   :  { %249 = vmatmul.f32.vlgmr.msrb.gmra.mxu1 %v193_v22 }
  0xab   :  { %v188_v24 = vadd.f32 %v187_v19, %v165_v23  ;;  %v121_v25 = vpop.f32.mrf.mxu0 }
  0xac   :  { %v122_v27 = vadd.f32 %v121_v25, %v90_v14 }
  0xad   :  { %v194_v28 = vmax.f32 %v188_v24, 0.0 }
  0xae   :  { %v145_v29 = vadd.f32 %v144_v26, %v122_v27 }
  0xaf   :  { %294 = vmatmul.msk.f32.vlgmr.msrb.gmra.mxu3 %vm226_vm1, %v194_v28 }
  0xb0   :  { %v167_v30 = vpop.f32.mrf.mxu2  ;;  %v195_v32 = vmax.f32 %v145_v29, 0.0 }
  0xb1   :  { %v168_v33 = vadd.f32 %v167_v30, %v91_v18 }
  0xb2   :  { %252 = vmatmul.f32.gmra.mxu1 %v195_v32 }
  0xb3   :  { %v191_v34 = vadd.f32 %v190_v31, %v168_v33 }
  0xb5   :  { %v196_v35 = vmax.f32 %v191_v34, 0.0 }
  0xb7   :  { %295 = vmatmul.msk.f32.gmra.mxu3 %vm226_vm1, %v196_v35 }
 0x127   :  { %v250_v37 = vpop.f32.mrf.mxu1 }
 0x128   :  { %v251_v38 = vadd.f32 %v300_v36, %v250_v37 }
 0x12f   :  { %v253_v41 = vpop.f32.mrf.mxu1 }
 0x130   :  { %v254_v42 = vadd.f32 %v300_v36, %v253_v41 }
 0x132   :  { %v273_v39 = vpop.f32.mrf.mxu3 }
 0x133   :  { %v274_v40 = vadd.f32 %v273_v39, %v251_v38 }
 0x13a   :  { %v276_v43 = vpop.f32.mrf.mxu3 }
 0x13b   :  { %v277_v44 = vadd.f32 %v276_v43, %v254_v42 }
 0x13d   :  { %280 = vrot.lane.b32.xlu0 %v277_v44, %s330_s6 }
 0x1af   :  { %v281_v45 = vpop.permute.xlu0 %280 }
 0x1b0   :  { %v283_v46 = vsel %vm94_vm0, %v274_v40, %v281_v45 }
 0x1b1   :  { %284 = vst [vmem:[%s470_s5] sm:$0xff] %v283_v46 }
 0x1b2   :  { %289 = vsyncpa [#allocation3], 1 }

// kernel: forward.4
= control target key start
LH: loop header
LB: loop body
LE: loop exit
PB: predicated region body
PF: predicated region fallthrough
CT: control target
= control target key end

     0   :  { %s304_s2 = inlined_call_operand.vmem [shape: f32[256,128], index: 2, kind: input, shape index: {}]   ;;  %s305_s1 = inlined_call_operand.vmem [shape: f32[16,128], index: 1, kind: input, shape index: {}]   ;;  %s306_s0 = inlined_call_operand.vmem [shape: f32[16,128], index: 0, kind: input, shape index: {}]   ;;  %s307_s3 = inlined_call_operand.vmem [shape: f32[16,256], index: 3, kind: output, shape index: {}]  }
   0x1   :  { %v33_v0 = vld [vmem:[%s304_s2 + $0x78] sm:$0xff]  ;;  %v32_v2 = vld [vmem:[%s304_s2 + $0x70] sm:$0xff]  ;;  %v31_v4 = vld [vmem:[%s304_s2 + $0x68] sm:$0xff] }
   0x2   :  { %v49_v1 = vld [vmem:[%s304_s2 + $0xf8] sm:$0xff]  ;;  %96 = vmatpush.xpose.msra.mxu2 %v33_v0  ;;  %v48_v3 = vld [vmem:[%s304_s2 + $0xf0] sm:$0xff]  ;;  %50 = vmatpush.xpose.msra.mxu0 %v33_v0  ;;  %v47_v5 = vld [vmem:[%s304_s2 + $0xe8] sm:$0xff] }
   0x3   :  { %119 = vmatpush.xpose.msra.mxu3 %v49_v1  ;;  %73 = vmatpush.xpose.msra.mxu1 %v49_v1  ;;  %v30_v6 = vld [vmem:[%s304_s2 + $0x60] sm:$0xff]  ;;  %v29_v8 = vld [vmem:[%s304_s2 + $0x58] sm:$0xff]  ;;  %v28_v10 = vld [vmem:[%s304_s2 + $0x50] sm:$0xff] }
   0x4   :  { %v46_v7 = vld [vmem:[%s304_s2 + $0xe0] sm:$0xff]  ;;  %v45_v9 = vld [vmem:[%s304_s2 + $0xd8] sm:$0xff]  ;;  %v44_v11 = vld [vmem:[%s304_s2 + $0xd0] sm:$0xff] }
   0x5   :  { %v27_v12 = vld [vmem:[%s304_s2 + $0x48] sm:$0xff]  ;;  %v26_v14 = vld [vmem:[%s304_s2 + $0x40] sm:$0xff]  ;;  %v25_v16 = vld [vmem:[%s304_s2 + $0x38] sm:$0xff] }
   0x6   :  { %97 = vmatpush.xpose.msra.mxu2 %v32_v2  ;;  %51 = vmatpush.xpose.msra.mxu0 %v32_v2  ;;  %v43_v13 = vld [vmem:[%s304_s2 + $0xc8] sm:$0xff]  ;;  %v42_v15 = vld [vmem:[%s304_s2 + $0xc0] sm:$0xff]  ;;  %v41_v17 = vld [vmem:[%s304_s2 + $0xb8] sm:$0xff] }
   0x7   :  { %120 = vmatpush.xpose.msra.mxu3 %v48_v3  ;;  %74 = vmatpush.xpose.msra.mxu1 %v48_v3  ;;  %v24_v18 = vld [vmem:[%s304_s2 + $0x30] sm:$0xff]  ;;  %v23_v20 = vld [vmem:[%s304_s2 + $0x28] sm:$0xff]  ;;  %v16_v22 = vld [vmem:[%s305_s1] sm:$0xff] }
   0x8   :  { %v40_v19 = vld [vmem:[%s304_s2 + $0xb0] sm:$0xff]  ;;  %v39_v21 = vld [vmem:[%s304_s2 + $0xa8] sm:$0xff]  ;;  %v14_v23 = vld [vmem:[%s306_s0] sm:$0xff] }
   0x9   :  { %v142_v24 = vmul.f32 %v16_v22, %v14_v23  ;;  %v22_v25 = vld [vmem:[%s304_s2 + $0x20] sm:$0xff]  ;;  %v21_v27 = vld [vmem:[%s304_s2 + $0x18] sm:$0xff]  ;;  %v17_v29 = vld [vmem:[%s305_s1 + $0x8] sm:$0xff] }
   0xa   :  { %98 = vmatpush.xpose.msra.mxu2 %v31_v4  ;;  %52 = vmatpush.xpose.msra.mxu0 %v31_v4  ;;  %v38_v26 = vld [vmem:[%s304_s2 + $0xa0] sm:$0xff]  ;;  %v37_v28 = vld [vmem:[%s304_s2 + $0x98] sm:$0xff]  ;;  %v15_v30 = vld [vmem:[%s306_s0 + $0x8] sm:$0xff] }
   0xb   :  { %121 = vmatpush.xpose.msra.mxu3 %v47_v5  ;;  %75 = vmatpush.xpose.msra.mxu1 %v47_v5  ;;  %v143_v31 = vmul.f32 %v17_v29, %v15_v30  ;;  %v20_v32 = vld [vmem:[%s304_s2 + $0x10] sm:$0xff]  ;;  %v19_v34 = vld [vmem:[%s304_s2 + $0x8] sm:$0xff]  ;;  %v18_v36 = vld [vmem:[%s304_s2] sm:$0xff] }
   0xc   :  { %144 = vadd.xlane.f32.xlu0 %v142_v24  ;;  %v36_v33 = vld [vmem:[%s304_s2 + $0x90] sm:$0xff]  ;;  %v35_v35 = vld [vmem:[%s304_s2 + $0x88] sm:$0xff]  ;;  %v34_v37 = vld [vmem:[%s304_s2 + $0x80] sm:$0xff] }
   0xe   :  { %99 = vmatpush.xpose.msra.mxu2 %v30_v6  ;;  %53 = vmatpush.xpose.msra.mxu0 %v30_v6 }
   0xf   :  { %122 = vmatpush.xpose.msra.mxu3 %v46_v7  ;;  %76 = vmatpush.xpose.msra.mxu1 %v46_v7 }
  0x12   :  { %100 = vmatpush.xpose.msra.mxu2 %v29_v8  ;;  %54 = vmatpush.xpose.msra.mxu0 %v29_v8 }
  0x13   :  { %123 = vmatpush.xpose.msra.mxu3 %v45_v9  ;;  %77 = vmatpush.xpose.msra.mxu1 %v45_v9 }
  0x14   :  { %146 = vadd.xlane.f32.xlu0 %v143_v31 }
  0x16   :  { %101 = vmatpush.xpose.msra.mxu2 %v28_v10  ;;  %55 = vmatpush.xpose.msra.mxu0 %v28_v10 }
  0x17   :  { %124 = vmatpush.xpose.msra.mxu3 %v44_v11  ;;  %78 = vmatpush.xpose.msra.mxu1 %v44_v11 }
  0x1a   :  { %102 = vmatpush.xpose.msra.mxu2 %v27_v12  ;;  %56 = vmatpush.xpose.msra.mxu0 %v27_v12 }
  0x1b   :  { %125 = vmatpush.xpose.msra.mxu3 %v43_v13  ;;  %79 = vmatpush.xpose.msra.mxu1 %v43_v13 }
  0x1e   :  { %103 = vmatpush.xpose.msra.mxu2 %v26_v14  ;;  %57 = vmatpush.xpose.msra.mxu0 %v26_v14 }
  0x1f   :  { %126 = vmatpush.xpose.msra.mxu3 %v42_v15  ;;  %80 = vmatpush.xpose.msra.mxu1 %v42_v15 }
  0x22   :  { %104 = vmatpush.xpose.msra.mxu2 %v25_v16  ;;  %58 = vmatpush.xpose.msra.mxu0 %v25_v16 }
  0x23   :  { %127 = vmatpush.xpose.msra.mxu3 %v41_v17  ;;  %81 = vmatpush.xpose.msra.mxu1 %v41_v17 }
  0x26   :  { %105 = vmatpush.xpose.msra.mxu2 %v24_v18  ;;  %59 = vmatpush.xpose.msra.mxu0 %v24_v18 }
  0x27   :  { %128 = vmatpush.xpose.msra.mxu3 %v40_v19  ;;  %82 = vmatpush.xpose.msra.mxu1 %v40_v19 }
  0x2a   :  { %106 = vmatpush.xpose.msra.mxu2 %v23_v20  ;;  %60 = vmatpush.xpose.msra.mxu0 %v23_v20 }
  0x2b   :  { %129 = vmatpush.xpose.msra.mxu3 %v39_v21  ;;  %83 = vmatpush.xpose.msra.mxu1 %v39_v21 }
  0x2e   :  { %107 = vmatpush.xpose.msra.mxu2 %v22_v25  ;;  %61 = vmatpush.xpose.msra.mxu0 %v22_v25 }
  0x2f   :  { %130 = vmatpush.xpose.msra.mxu3 %v38_v26  ;;  %84 = vmatpush.xpose.msra.mxu1 %v38_v26 }
  0x32   :  { %108 = vmatpush.xpose.msra.mxu2 %v21_v27  ;;  %62 = vmatpush.xpose.msra.mxu0 %v21_v27 }
  0x33   :  { %131 = vmatpush.xpose.msra.mxu3 %v37_v28  ;;  %85 = vmatpush.xpose.msra.mxu1 %v37_v28 }
  0x36   :  { %109 = vmatpush.xpose.msra.mxu2 %v20_v32  ;;  %63 = vmatpush.xpose.msra.mxu0 %v20_v32 }
  0x37   :  { %132 = vmatpush.xpose.msra.mxu3 %v36_v33  ;;  %86 = vmatpush.xpose.msra.mxu1 %v36_v33 }
  0x3a   :  { %110 = vmatpush.xpose.msra.mxu2 %v19_v34  ;;  %64 = vmatpush.xpose.msra.mxu0 %v19_v34 }
  0x3b   :  { %133 = vmatpush.xpose.msra.mxu3 %v35_v35  ;;  %87 = vmatpush.xpose.msra.mxu1 %v35_v35 }
  0x3e   :  { %111 = vmatpush.xpose.msra.mxu2 %v18_v36  ;;  %65 = vmatpush.xpose.msra.mxu0 %v18_v36 }
  0x3f   :  { %134 = vmatpush.xpose.msra.mxu3 %v34_v37  ;;  %88 = vmatpush.xpose.msra.mxu1 %v34_v37 }
  0x41   :  { %112 = vmatmul.f32.vlgmr.msra.gmra.mxu2 %v16_v22  ;;  %66 = vmatmul.f32.vlgmr.msra.gmra.mxu0 %v14_v23 }
  0x42   :  { %135 = vmatmul.f32.vlgmr.msra.gmra.mxu3 %v16_v22  ;;  %89 = vmatmul.f32.vlgmr.msra.gmra.mxu1 %v14_v23 }
  0x49   :  { %115 = vmatmul.f32.gmra.mxu2 %v17_v29  ;;  %69 = vmatmul.f32.gmra.mxu0 %v15_v30 }
  0x4a   :  { %138 = vmatmul.f32.gmra.mxu3 %v17_v29  ;;  %92 = vmatmul.f32.gmra.mxu1 %v15_v30 }
  0x7f   :  { %v145_v38 = vpop.xlane.xlu0 %144 }
  0x87   :  { %v147_v47 = vpop.xlane.xlu0 %146 }
  0xbe   :  { %v67_v39 = vpop.f32.mrf.mxu0 }
  0xbf   :  { %v90_v40 = vpop.f32.mrf.mxu1 }
  0xc4   :  { %v113_v41 = vpop.f32.mrf.mxu2 }
  0xc5   :  { %v136_v42 = vpop.f32.mrf.mxu3  ;;  %v148_v43 = vmul.f32 %v145_v38, %v113_v41 }
  0xc6   :  { %v149_v44 = vmul.f32 %v145_v38, %v136_v42  ;;  %v70_v48 = vpop.f32.mrf.mxu0 }
  0xc7   :  { %v152_v45 = vsub.f32 %v67_v39, %v148_v43  ;;  %v93_v49 = vpop.f32.mrf.mxu1 }
  0xc8   :  { %v153_v46 = vsub.f32 %v90_v40, %v149_v44 }
  0xc9   :  { %156 = vst [vmem:[%s307_s3] sm:$0xff] %v152_v45 }
  0xca   :  { %157 = vst [vmem:[%s307_s3 + $0x8] sm:$0xff] %v153_v46 }
  0xcc   :  { %v116_v50 = vpop.f32.mrf.mxu2 }
  0xcd   :  { %v139_v51 = vpop.f32.mrf.mxu3  ;;  %v150_v52 = vmul.f32 %v147_v47, %v116_v50 }
  0xce   :  { %v151_v53 = vmul.f32 %v147_v47, %v139_v51 }
  0xcf   :  { %v154_v54 = vsub.f32 %v70_v48, %v150_v52 }
  0xd0   :  { %v155_v55 = vsub.f32 %v93_v49, %v151_v53 }
  0xd1   :  { %158 = vst [vmem:[%s307_s3 + $0x10] sm:$0xff] %v154_v54 }
  0xd2   :  { %159 = vst [vmem:[%s307_s3 + $0x18] sm:$0xff] %v155_v55 }

// kernel: forward.5
= control target key start
LH: loop header
LB: loop body
LE: loop exit
PB: predicated region body
PF: predicated region fallthrough
CT: control target
= control target key end

     0   :  { %s163_s0 = inlined_call_operand.vmem [shape: f32[8,128], index: 0, kind: input, shape index: {}]   ;;  %s164_s1 = inlined_call_operand.vmem [shape: f32[128,128], index: 1, kind: input, shape index: {}]   ;;  %s165_s2 = inlined_call_operand.hbm [shape: f32[8,128], index: 2, kind: output, shape index: {}]  }
   0x1   :  { %v28_v0 = vld [vmem:[%s164_s1 + $0x78] sm:$0xff]  ;;  %v27_v1 = vld [vmem:[%s164_s1 + $0x70] sm:$0xff] }
   0x2   :  { %29 = vmatpush.xpose.msra.mxu0 %v28_v0 }
   0x3   :  { %7 = vsyncpa [#allocation3], 0  ;;  %v26_v2 = vld [vmem:[%s164_s1 + $0x68] sm:$0xff]  ;;  %v25_v3 = vld [vmem:[%s164_s1 + $0x60] sm:$0xff]  ;;  %s93_s15 = smov [#allocation2]   ;;  %s57_s19 = sshll.u32 %s165_s2, 4  ;;  %s58_s19 = int_to_ptr.hbm [resolvable:$true] %s57_s19 }
   0x4   :  { %v24_v4 = vld [vmem:[%s164_s1 + $0x58] sm:$0xff]  ;;  %v23_v5 = vld [vmem:[%s164_s1 + $0x50] sm:$0xff]  ;;  %v22_v6 = vld [vmem:[%s164_s1 + $0x48] sm:$0xff]  ;;  %s55_s16 = sshll.u32 %s93_s15, 4  ;;  %s56_s16 = int_to_ptr.vmem [resolvable:$true] %s55_s16 }
   0x5   :  { %v21_v7 = vld [vmem:[%s164_s1 + $0x40] sm:$0xff]  ;;  %v20_v8 = vld [vmem:[%s164_s1 + $0x38] sm:$0xff]  ;;  %v19_v9 = vld [vmem:[%s164_s1 + $0x30] sm:$0xff] }
   0x6   :  { %30 = vmatpush.xpose.msra.mxu0 %v27_v1  ;;  %v18_v10 = vld [vmem:[%s164_s1 + $0x28] sm:$0xff]  ;;  %v17_v11 = vld [vmem:[%s164_s1 + $0x20] sm:$0xff]  ;;  %v16_v12 = vld [vmem:[%s164_s1 + $0x18] sm:$0xff] }
   0x7   :  { %v15_v13 = vld [vmem:[%s164_s1 + $0x10] sm:$0xff]  ;;  %v14_v14 = vld [vmem:[%s164_s1 + $0x8] sm:$0xff]  ;;  %v13_v15 = vld [vmem:[%s164_s1] sm:$0xff] }
   0x8   :  { %v12_v16 = vld [vmem:[%s163_s0] sm:$0xff] }
   0xa   :  { %31 = vmatpush.xpose.msra.mxu0 %v26_v2 }
   0xe   :  { %32 = vmatpush.xpose.msra.mxu0 %v25_v3 }
  0x12   :  { %33 = vmatpush.xpose.msra.mxu0 %v24_v4 }
  0x16   :  { %34 = vmatpush.xpose.msra.mxu0 %v23_v5 }
  0x1a   :  { %35 = vmatpush.xpose.msra.mxu0 %v22_v6 }
  0x1e   :  { %36 = vmatpush.xpose.msra.mxu0 %v21_v7 }
  0x22   :  { %37 = vmatpush.xpose.msra.mxu0 %v20_v8 }
  0x26   :  { %38 = vmatpush.xpose.msra.mxu0 %v19_v9 }
  0x2a   :  { %39 = vmatpush.xpose.msra.mxu0 %v18_v10 }
  0x2e   :  { %40 = vmatpush.xpose.msra.mxu0 %v17_v11 }
  0x32   :  { %41 = vmatpush.xpose.msra.mxu0 %v16_v12 }
  0x36   :  { %42 = vmatpush.xpose.msra.mxu0 %v15_v13 }
  0x3a   :  { %43 = vmatpush.xpose.msra.mxu0 %v14_v14 }
  0x3e   :  { %44 = vmatpush.xpose.msra.mxu0 %v13_v15 }
  0x41   :  { %45 = vmatmul.f32.vlgmr.msra.gmra.mxu0 %v12_v16 }
  0xbe   :  { %v46_v17 = vpop.f32.mrf.mxu0 }
  0xbf   :  { %49 = vst [vmem:[#allocation2] sm:$0xff] %v46_v17 }
  0xc0   :  { %60 = dma.vmem_to_hbm [thread:$0]  %s56_s16, 128, %s58_s19, [#allocation3]  }
  0xc1   :  { %91 = dma.done.wait [#allocation3], 128  }
  0xc2   :  { %92 = vsyncadd [#allocation3], 4294967168 }
  0xc3   :  { %65 = vsyncpa [#allocation3], 1 }

</bundles_post_ra>
